<compile_context>
chip_gen: v7x
topology: tpu7x:2x2x1
jax: 0.10.0
libtpu: 0.0.40
codegen_flags: <defaults>
</compile_context>

<pallas_src>
import functools

import jax
import jax.numpy as jnp
import numpy as np
from jax import lax
from jax.experimental import pallas as pl
from jax.experimental.pallas import tpu as pltpu

LAYER_NORM_EPS = 1e-12

# Default row tile; the actual tile is re-derived from the VMEM budget below.
TILE_M_DEFAULT = 1024


def _default_vmem_limit():
    """~100 MiB on 128-MiB chips (v5e/v6e), ~56 MiB on v7x; safe fallback."""
    try:
        cap = int(pltpu.get_tpu_info().vmem_capacity_bytes)
        return min(cap - (8 << 20), 100 << 20)
    except Exception:
        return 56 << 20  # fits every generation (v7x has 64 MiB physical)


def _choose_tile_m(M, requested, vmem_limit, resident_bytes, bytes_per_row):
    """Pick a row tile: fill VMEM budget, multiple of 8, >=2 grid steps."""
    budget = max(vmem_limit - resident_bytes - (4 << 20), 1 << 20)
    tm = min(int(requested), max(8, budget // max(bytes_per_row, 1)))
    tm = max(8, (tm // 8) * 8)
    # v7x has 2 TensorCores: keep the parallel M axis at >= 2 grid steps.
    if tm >= M and M > 8:
        tm = max(8, (((M + 1) // 2) + 7) // 8 * 8)
    return min(tm, M)


def _combine_ln_kernel(x_ref, nid_ref, cid_ref, w_ref, tbl_ref, b_ref,
                       gamma_ref, beta_ref, o_ref, *, p_note, p_total):
    # x_ref:   (TM, H)     input tile (streamed)
    # nid_ref: (TM, 1) i32 note ids   (streamed)
    # cid_ref: (TM, 1) i32 chunk ids  (streamed)
    # w_ref:   (H, H) bf16 input-projection slab (VMEM-resident)
    # tbl_ref: (Ptot, H) bf16 concat of pre-projected note/chunk tables (resident)
    # b_ref / gamma_ref / beta_ref: (1, H) f32 (resident)
    # o_ref:   (TM, H)
    tm = x_ref.shape[0]

    # (1) input projection: MXU matmul in bf16, f32 accumulation.
    y = jnp.dot(x_ref[...].astype(jnp.bfloat16), w_ref[...],
                preferred_element_type=jnp.float32)

    # (2) fused note+chunk gather-add via a "two-hot" MXU matmul against the
    #     resident pre-projected table (note rows [0,p_note), chunk rows after).
    iota = lax.broadcasted_iota(jnp.int32, (tm, p_total), 1)
    two_hot = ((iota == nid_ref[...]) |
               (iota == (cid_ref[...] + p_note))).astype(jnp.bfloat16)
    y = y + jnp.dot(two_hot, tbl_ref[...], preferred_element_type=jnp.float32)
    y = y + b_ref[...]

    # (3) LayerNorm over the hidden (lane) axis, f32 math on the VPU.
    mean = jnp.mean(y, axis=-1, keepdims=True)
    centered = y - mean
    var = jnp.mean(centered * centered, axis=-1, keepdims=True)
    inv = lax.rsqrt(var + LAYER_NORM_EPS)
    o_ref[...] = (centered * inv * gamma_ref[...] + beta_ref[...]).astype(
        o_ref.dtype)


def combine_and_layernorm(x, note_ids, chunk_ids, w_in_bf16, proj_tbl_bf16,
                          p_note, b, gamma, beta, *,
                          tile_m=TILE_M_DEFAULT, out_dtype=None,
                          vmem_limit_bytes=None):
    """y = LN(x @ W_in + proj_tbl[nid] + proj_tbl[p_note+cid] + b).

    x:             (M, H)           note_ids/chunk_ids: (M, 1) int32
    w_in_bf16:     (H, H)  bf16     proj_tbl_bf16: (Ptot, H) bf16
    b/gamma/beta:  (H,)    f32      returns: (M, H) out_dtype (default x.dtype)
    """
    M, H = x.shape
    p_total = proj_tbl_bf16.shape[0]
    out_dtype = x.dtype if out_dtype is None else out_dtype
    if vmem_limit_bytes is None:
        vmem_limit_bytes = _default_vmem_limit()

    x_bytes = np.dtype(x.dtype).itemsize
    o_bytes = np.dtype(out_dtype).itemsize
    resident_bytes = H * H * 2 + p_total * H * 2 + 3 * H * 4
    # Streamed bytes per row (x + out + 2 id cols), double-buffered.
    bytes_per_row = 2 * (H * (x_bytes + o_bytes) + 2 * 4)
    tile_m = _choose_tile_m(M, tile_m, vmem_limit_bytes, resident_bytes,
                            bytes_per_row)
    grid = (pl.cdiv(M, tile_m),)

    b2 = b.reshape(1, H).astype(jnp.float32)
    g2 = gamma.reshape(1, H).astype(jnp.float32)
    be2 = beta.reshape(1, H).astype(jnp.float32)

    kernel = functools.partial(_combine_ln_kernel, p_note=p_note,
                               p_total=p_total)
    cost = pl.CostEstimate(
        flops=2 * M * H * H + 2 * M * p_total * H + 10 * M * H,
        transcendentals=0,
        bytes_accessed=M * H * (x_bytes + o_bytes) + 2 * M * 4 + resident_bytes,
    )

    def call(single_buffer_resident):
        def resident(shape):
            if single_buffer_resident:
                # Grid-invariant operands: single buffer (halves VMEM cost).
                return pl.BlockSpec(shape, lambda i: (0, 0),
                                    pipeline_mode=pl.Buffered(1))
            return pl.BlockSpec(shape, lambda i: (0, 0))

        row_spec = pl.BlockSpec((tile_m, H), lambda i: (i, 0))
        id_spec = pl.BlockSpec((tile_m, 1), lambda i: (i, 0))

        fn = pl.pallas_call(
            kernel,
            out_shape=jax.ShapeDtypeStruct((M, H), out_dtype),
            grid_spec=pltpu.PrefetchScalarGridSpec(
                num_scalar_prefetch=0,
                grid=grid,
                in_specs=[
                    row_spec,                # x            (streamed)
                    id_spec,                 # note ids     (streamed)
                    id_spec,                 # chunk ids    (streamed)
                    resident((H, H)),        # W_in bf16    (resident)
                    resident((p_total, H)),  # proj table   (resident)
                    resident((1, H)),        # bias
                    resident((1, H)),        # gamma
                    resident((1, H)),        # beta
                ],
                out_specs=row_spec,
            ),
            compiler_params=pltpu.CompilerParams(
                dimension_semantics=("parallel",),
                vmem_limit_bytes=int(vmem_limit_bytes),
            ),
            cost_estimate=cost,
        )
        return fn(x, note_ids, chunk_ids, w_in_bf16, proj_tbl_bf16, b2, g2, be2)

    try:
        return call(True)
    except Exception:
        # Fallback if this jax build rejects Buffered(1) on the main pipeline:
        # identical semantics, just default double-buffered resident operands.
        return call(False)


def patient_level_embedding_forward(params, inputs, new_note_ids,
                                     new_chunk_ids, *, out_dtype=None):
    """embed_mode='all' forward (eval mode).

    inputs:        (B, S, H) float32 (or bfloat16)
    new_note_ids:  (B, S)   int32
    new_chunk_ids: (B, S)   int32
    returns:       (B, S, H) inputs.dtype (or out_dtype)
    """
    B, S, H = inputs.shape
    M = B * S

    # combine_embed_rep weight stored (3H, H) == PyTorch nn.Linear.weight.T;
    # rows [0:H) multiply `inputs`, [H:2H) the note embeds, [2H:3H) the chunk
    # embeds (matching torch.cat([inputs, note, chunk], dim=2)).
    w = params["combine_w"]
    w_in, w_note, w_chunk = w[:H], w[H:2 * H], w[2 * H:]

    # Fold the note/chunk slabs into the tiny tables once (plain JAX, f32),
    # concatenate and hand the result to the kernel, which gathers + adds the
    # rows in VMEM.  No (M,H) gather arrays ever touch HBM.
    note_tbl = jnp.dot(params["note_embedding"], w_note,
                       preferred_element_type=jnp.float32)
    chunk_tbl = jnp.dot(params["chunk_embedding"], w_chunk,
                        preferred_element_type=jnp.float32)
    proj_tbl = jnp.concatenate([note_tbl, chunk_tbl],
                               axis=0).astype(jnp.bfloat16)
    p_note = note_tbl.shape[0]

    x_flat = inputs.reshape(M, H)
    nid = new_note_ids.reshape(M, 1).astype(jnp.int32)
    cid = new_chunk_ids.reshape(M, 1).astype(jnp.int32)

    out_flat = combine_and_layernorm(
        x_flat, nid, cid,
        w_in.astype(jnp.bfloat16),      # resident bf16 MXU operand
        proj_tbl, p_note,
        params["combine_b"], params["ln_gamma"], params["ln_beta"],
        out_dtype=out_dtype,
    )

    # Dropout: eval mode -> identity.
    return out_flat.reshape(B, S, H)


def init_params(key, hidden_size, max_note_pos, max_chunk_pos):
    k1, k2, k3, k4 = jax.random.split(key, 4)
    H = hidden_size
    return {
        "note_embedding": jax.random.normal(k1, (max_note_pos, H), jnp.float32) * 0.02,
        "chunk_embedding": jax.random.normal(k2, (max_chunk_pos, H), jnp.float32) * 0.02,
        # nn.Linear(3H, H): weight stored already transposed to (in, out).
        "combine_w": jax.random.normal(k3, (3 * H, H), jnp.float32) * 0.02,
        "combine_b": jax.random.normal(k4, (H,), jnp.float32) * 0.02,
        "ln_gamma": jnp.ones((H,), jnp.float32),
        "ln_beta": jnp.zeros((H,), jnp.float32),
    }


def _reference_forward(params, inputs, new_note_ids, new_chunk_ids):
    """Pure-JAX f32 reference matching the PyTorch module (eval mode)."""
    note_embeds = jnp.take(params["note_embedding"], new_note_ids, axis=0)
    chunk_embeds = jnp.take(params["chunk_embedding"], new_chunk_ids, axis=0)
    x_cat = jnp.concatenate([inputs, note_embeds, chunk_embeds], axis=2)
    y = jnp.dot(x_cat, params["combine_w"]) + params["combine_b"]
    mean = jnp.mean(y, axis=-1, keepdims=True)
    var = jnp.mean((y - mean) ** 2, axis=-1, keepdims=True)
    y = (y - mean) * lax.rsqrt(var + LAYER_NORM_EPS)
    return y * params["ln_gamma"] + params["ln_beta"]


if __name__ == "__main__":
    B, S, H = 2, 8, 32
    MAX_NOTE, MAX_CHUNK = 16, 16

    key = jax.random.PRNGKey(0)
    kp, kx, kn, kc = jax.random.split(key, 4)

    params = init_params(kp, H, MAX_NOTE, MAX_CHUNK)

    inputs = jax.random.normal(kx, (B, S, H), jnp.float32)
    new_note_ids = jax.random.randint(kn, (B, S), 0, MAX_NOTE, jnp.int32)
    new_chunk_ids = jax.random.randint(kc, (B, S), 0, MAX_CHUNK, jnp.int32)

    out = patient_level_embedding_forward(params, inputs, new_note_ids,
                                          new_chunk_ids)
    out = jax.block_until_ready(out)

    assert out.shape == (B, S, H)
    assert bool(jnp.all(jnp.isfinite(out)))

    # Loose tolerance: kernel feeds bf16 operands to the MXU (f32 accumulate)
    # and the pre-projected gather table is stored bf16.
    ref = _reference_forward(params, inputs, new_note_ids, new_chunk_ids)
    np.testing.assert_allclose(np.asarray(out), np.asarray(ref),
                               rtol=8e-2, atol=8e-2)

    print("KERNEL_OK")
</pallas_src>

<mosaic_0001>
module attributes {stable_mosaic.version = 11 : i64} {
  func.func @_combine_ln_kernel(%arg0: i32, %arg1: memref<8x32xf32, #tpu.memory_space<vmem>>, %arg2: memref<8x1xi32, #tpu.memory_space<vmem>>, %arg3: memref<8x1xi32, #tpu.memory_space<vmem>>, %arg4: memref<32x32xbf16, #tpu.memory_space<vmem>>, %arg5: memref<32x32xbf16, #tpu.memory_space<vmem>>, %arg6: memref<1x32xf32, #tpu.memory_space<vmem>>, %arg7: memref<1x32xf32, #tpu.memory_space<vmem>>, %arg8: memref<1x32xf32, #tpu.memory_space<vmem>>, %arg9: memref<8x32xf32, #tpu.memory_space<vmem>>) attributes {dimension_semantics = [#tpu.dimension_semantics<parallel>], iteration_bounds = array<i64: 2>, scalar_prefetch = 0 : i64, scratch_operands = 0 : i64, tpu.core_type = #tpu.core_type<tc>, window_params = [{transform_indices = @transform_0, window_bounds = array<i64: 8, 32>}, {transform_indices = @transform_1, window_bounds = array<i64: 8, 1>}, {transform_indices = @transform_2, window_bounds = array<i64: 8, 1>}, {pipeline_mode = #tpu.pipeline_mode<synchronous>, transform_indices = @transform_3, window_bounds = array<i64: 32, 32>}, {pipeline_mode = #tpu.pipeline_mode<synchronous>, transform_indices = @transform_4, window_bounds = array<i64: 32, 32>}, {pipeline_mode = #tpu.pipeline_mode<synchronous>, transform_indices = @transform_5, window_bounds = array<i64: 1, 32>}, {pipeline_mode = #tpu.pipeline_mode<synchronous>, transform_indices = @transform_6, window_bounds = array<i64: 1, 32>}, {pipeline_mode = #tpu.pipeline_mode<synchronous>, transform_indices = @transform_7, window_bounds = array<i64: 1, 32>}, {transform_indices = @transform_8, window_bounds = array<i64: 8, 32>}]} {
    %c0 = arith.constant 0 : index
    %c0_0 = arith.constant 0 : index
    %0 = vector.load %arg1[%c0, %c0_0] : memref<8x32xf32, #tpu.memory_space<vmem>>, vector<8x32xf32>
    %1 = arith.truncf %0 : vector<8x32xf32> to vector<8x32xbf16>
    %c0_1 = arith.constant 0 : index
    %c0_2 = arith.constant 0 : index
    %2 = vector.load %arg4[%c0_1, %c0_2] : memref<32x32xbf16, #tpu.memory_space<vmem>>, vector<32x32xbf16>
    %cst = arith.constant dense<0.000000e+00> : vector<8x32xf32>
    %3 = tpu.matmul %1, %2, %cst {dimension_numbers = #tpu.dot_dimension_numbers<[1], [0], [0], [1], [0, 0, 1, 1], [], []>} : vector<8x32xbf16>, vector<32x32xbf16>, vector<8x32xf32> -> vector<8x32xf32>
    %4 = tpu.iota {dimensions = array<i32: 1>} : vector<8x32xi32>
    %c0_3 = arith.constant 0 : index
    %c0_4 = arith.constant 0 : index
    %5 = vector.load %arg2[%c0_3, %c0_4] : memref<8x1xi32, #tpu.memory_space<vmem>>, vector<8x1xi32>
    %6 = vector.broadcast %5 : vector<8x1xi32> to vector<8x32xi32>
    %7 = arith.cmpi eq, %4, %6 : vector<8x32xi32>
    %c0_5 = arith.constant 0 : index
    %c0_6 = arith.constant 0 : index
    %8 = vector.load %arg3[%c0_5, %c0_6] : memref<8x1xi32, #tpu.memory_space<vmem>>, vector<8x1xi32>
    %c16_i32 = arith.constant 16 : i32
    %9 = vector.broadcast %c16_i32 : i32 to vector<8x1xi32>
    %10 = arith.addi %8, %9 : vector<8x1xi32>
    %11 = vector.broadcast %10 : vector<8x1xi32> to vector<8x32xi32>
    %12 = arith.cmpi eq, %4, %11 : vector<8x32xi32>
    %13 = arith.ori %7, %12 : vector<8x32xi1>
    %14 = arith.extui %13 : vector<8x32xi1> to vector<8x32xi32>
    %15 = arith.sitofp %14 : vector<8x32xi32> to vector<8x32xf32>
    %16 = arith.truncf %15 : vector<8x32xf32> to vector<8x32xbf16>
    %c0_7 = arith.constant 0 : index
    %c0_8 = arith.constant 0 : index
    %17 = vector.load %arg5[%c0_7, %c0_8] : memref<32x32xbf16, #tpu.memory_space<vmem>>, vector<32x32xbf16>
    %cst_9 = arith.constant dense<0.000000e+00> : vector<8x32xf32>
    %18 = tpu.matmul %16, %17, %cst_9 {dimension_numbers = #tpu.dot_dimension_numbers<[1], [0], [0], [1], [0, 0, 1, 1], [], []>} : vector<8x32xbf16>, vector<32x32xbf16>, vector<8x32xf32> -> vector<8x32xf32>
    %19 = arith.addf %3, %18 : vector<8x32xf32>
    %c0_10 = arith.constant 0 : index
    %c0_11 = arith.constant 0 : index
    %20 = vector.load %arg6[%c0_10, %c0_11] : memref<1x32xf32, #tpu.memory_space<vmem>>, vector<1x32xf32>
    %21 = vector.broadcast %20 : vector<1x32xf32> to vector<8x32xf32>
    %22 = arith.addf %19, %21 : vector<8x32xf32>
    %cst_12 = arith.constant dense<0.000000e+00> : vector<8xf32>
    %23 = vector.multi_reduction <add>, %22, %cst_12 [1] : vector<8x32xf32> to vector<8xf32>
    %24 = vector.shape_cast %23 : vector<8xf32> to vector<8x1xf32>
    %cst_13 = arith.constant 3.200000e+01 : f32
    %25 = vector.broadcast %cst_13 : f32 to vector<8x1xf32>
    %26 = arith.divf %24, %25 : vector<8x1xf32>
    %27 = vector.broadcast %26 : vector<8x1xf32> to vector<8x32xf32>
    %28 = arith.subf %22, %27 : vector<8x32xf32>
    %29 = arith.mulf %28, %28 : vector<8x32xf32>
    %cst_14 = arith.constant dense<0.000000e+00> : vector<8xf32>
    %30 = vector.multi_reduction <add>, %29, %cst_14 [1] : vector<8x32xf32> to vector<8xf32>
    %31 = vector.shape_cast %30 : vector<8xf32> to vector<8x1xf32>
    %cst_15 = arith.constant 3.200000e+01 : f32
    %32 = vector.broadcast %cst_15 : f32 to vector<8x1xf32>
    %33 = arith.divf %31, %32 : vector<8x1xf32>
    %cst_16 = arith.constant 9.99999996E-13 : f32
    %34 = vector.broadcast %cst_16 : f32 to vector<8x1xf32>
    %35 = arith.addf %33, %34 : vector<8x1xf32>
    %36 = math.rsqrt %35 : vector<8x1xf32>
    %37 = vector.broadcast %36 : vector<8x1xf32> to vector<8x32xf32>
    %38 = arith.mulf %28, %37 : vector<8x32xf32>
    %c0_17 = arith.constant 0 : index
    %c0_18 = arith.constant 0 : index
    %39 = vector.load %arg7[%c0_17, %c0_18] : memref<1x32xf32, #tpu.memory_space<vmem>>, vector<1x32xf32>
    %40 = vector.broadcast %39 : vector<1x32xf32> to vector<8x32xf32>
    %41 = arith.mulf %38, %40 : vector<8x32xf32>
    %c0_19 = arith.constant 0 : index
    %c0_20 = arith.constant 0 : index
    %42 = vector.load %arg8[%c0_19, %c0_20] : memref<1x32xf32, #tpu.memory_space<vmem>>, vector<1x32xf32>
    %43 = vector.broadcast %42 : vector<1x32xf32> to vector<8x32xf32>
    %44 = arith.addf %41, %43 : vector<8x32xf32>
    %c0_21 = arith.constant 0 : index
    %c0_22 = arith.constant 0 : index
    %45 = vector.load %arg9[%c0_21, %c0_22] : memref<8x32xf32, #tpu.memory_space<vmem>>, vector<8x32xf32>
    tpu.vector_store %arg9[%c0_21, %c0_22], %44 {strides = array<i32>} : memref<8x32xf32, #tpu.memory_space<vmem>>, vector<8x32xf32>,
    return
  }
  func.func @transform_0(%arg0: i32) -> (i32, i32) {
    %c0_i32 = arith.constant 0 : i32
    %c0_i32_0 = arith.constant 0 : i32
    return %arg0, %c0_i32 : i32, i32
  }
  func.func @transform_1(%arg0: i32) -> (i32, i32) {
    %c0_i32 = arith.constant 0 : i32
    %c0_i32_0 = arith.constant 0 : i32
    return %arg0, %c0_i32 : i32, i32
  }
  func.func @transform_2(%arg0: i32) -> (i32, i32) {
    %c0_i32 = arith.constant 0 : i32
    %c0_i32_0 = arith.constant 0 : i32
    return %arg0, %c0_i32 : i32, i32
  }
  func.func @transform_3(%arg0: i32) -> (i32, i32) {
    %c0_i32 = arith.constant 0 : i32
    %c0_i32_0 = arith.constant 0 : i32
    %c0_i32_1 = arith.constant 0 : i32
    return %c0_i32, %c0_i32_0 : i32, i32
  }
  func.func @transform_4(%arg0: i32) -> (i32, i32) {
    %c0_i32 = arith.constant 0 : i32
    %c0_i32_0 = arith.constant 0 : i32
    %c0_i32_1 = arith.constant 0 : i32
    return %c0_i32, %c0_i32_0 : i32, i32
  }
  func.func @transform_5(%arg0: i32) -> (i32, i32) {
    %c0_i32 = arith.constant 0 : i32
    %c0_i32_0 = arith.constant 0 : i32
    %c0_i32_1 = arith.constant 0 : i32
    return %c0_i32, %c0_i32_0 : i32, i32
  }
  func.func @transform_6(%arg0: i32) -> (i32, i32) {
    %c0_i32 = arith.constant 0 : i32
    %c0_i32_0 = arith.constant 0 : i32
    %c0_i32_1 = arith.constant 0 : i32
    return %c0_i32, %c0_i32_0 : i32, i32
  }
  func.func @transform_7(%arg0: i32) -> (i32, i32) {
    %c0_i32 = arith.constant 0 : i32
    %c0_i32_0 = arith.constant 0 : i32
    %c0_i32_1 = arith.constant 0 : i32
    return %c0_i32, %c0_i32_0 : i32, i32
  }
  func.func @transform_8(%arg0: i32) -> (i32, i32) {
    %c0_i32 = arith.constant 0 : i32
    %c0_i32_0 = arith.constant 0 : i32
    return %arg0, %c0_i32 : i32, i32
  }
}

module attributes {stable_mosaic.version = 11 : i64} {
  func.func @_combine_ln_kernel(%arg0: i32, %arg1: memref<8x32xf32, #tpu.memory_space<vmem>>, %arg2: memref<8x1xi32, #tpu.memory_space<vmem>>, %arg3: memref<8x1xi32, #tpu.memory_space<vmem>>, %arg4: memref<32x32xbf16, #tpu.memory_space<vmem>>, %arg5: memref<32x32xbf16, #tpu.memory_space<vmem>>, %arg6: memref<1x32xf32, #tpu.memory_space<vmem>>, %arg7: memref<1x32xf32, #tpu.memory_space<vmem>>, %arg8: memref<1x32xf32, #tpu.memory_space<vmem>>, %arg9: memref<8x32xf32, #tpu.memory_space<vmem>>) attributes {dimension_semantics = [#tpu.dimension_semantics<parallel>], iteration_bounds = array<i64: 2>, scalar_prefetch = 0 : i64, scratch_operands = 0 : i64, tpu.core_type = #tpu.core_type<tc>, window_params = [{transform_indices = @transform_0, window_bounds = array<i64: 8, 32>}, {transform_indices = @transform_1, window_bounds = array<i64: 8, 1>}, {transform_indices = @transform_2, window_bounds = array<i64: 8, 1>}, {pipeline_mode = #tpu.pipeline_mode<synchronous>, transform_indices = @transform_3, window_bounds = array<i64: 32, 32>}, {pipeline_mode = #tpu.pipeline_mode<synchronous>, transform_indices = @transform_4, window_bounds = array<i64: 32, 32>}, {pipeline_mode = #tpu.pipeline_mode<synchronous>, transform_indices = @transform_5, window_bounds = array<i64: 1, 32>}, {pipeline_mode = #tpu.pipeline_mode<synchronous>, transform_indices = @transform_6, window_bounds = array<i64: 1, 32>}, {pipeline_mode = #tpu.pipeline_mode<synchronous>, transform_indices = @transform_7, window_bounds = array<i64: 1, 32>}, {transform_indices = @transform_8, window_bounds = array<i64: 8, 32>}]} {
    %c0 = arith.constant 0 : index
    %c0_0 = arith.constant 0 : index
    %0 = vector.load %arg1[%c0, %c0_0] : memref<8x32xf32, #tpu.memory_space<vmem>>, vector<8x32xf32>
    %1 = arith.truncf %0 : vector<8x32xf32> to vector<8x32xbf16>
    %c0_1 = arith.constant 0 : index
    %c0_2 = arith.constant 0 : index
    %2 = vector.load %arg4[%c0_1, %c0_2] : memref<32x32xbf16, #tpu.memory_space<vmem>>, vector<32x32xbf16>
    %cst = arith.constant dense<0.000000e+00> : vector<8x32xf32>
    %3 = tpu.matmul %1, %2, %cst {dimension_numbers = #tpu.dot_dimension_numbers<[1], [0], [0], [1], [0, 0, 1, 1], [], []>} : vector<8x32xbf16>, vector<32x32xbf16>, vector<8x32xf32> -> vector<8x32xf32>
    %4 = tpu.iota {dimensions = array<i32: 1>} : vector<8x32xi32>
    %c0_3 = arith.constant 0 : index
    %c0_4 = arith.constant 0 : index
    %5 = vector.load %arg2[%c0_3, %c0_4] : memref<8x1xi32, #tpu.memory_space<vmem>>, vector<8x1xi32>
    %6 = vector.broadcast %5 : vector<8x1xi32> to vector<8x32xi32>
    %7 = arith.cmpi eq, %4, %6 : vector<8x32xi32>
    %c0_5 = arith.constant 0 : index
    %c0_6 = arith.constant 0 : index
    %8 = vector.load %arg3[%c0_5, %c0_6] : memref<8x1xi32, #tpu.memory_space<vmem>>, vector<8x1xi32>
    %c16_i32 = arith.constant 16 : i32
    %9 = vector.broadcast %c16_i32 : i32 to vector<8x1xi32>
    %10 = arith.addi %8, %9 : vector<8x1xi32>
    %11 = vector.broadcast %10 : vector<8x1xi32> to vector<8x32xi32>
    %12 = arith.cmpi eq, %4, %11 : vector<8x32xi32>
    %13 = arith.ori %7, %12 : vector<8x32xi1>
    %14 = arith.extui %13 : vector<8x32xi1> to vector<8x32xi32>
    %15 = arith.sitofp %14 : vector<8x32xi32> to vector<8x32xf32>
    %16 = arith.truncf %15 : vector<8x32xf32> to vector<8x32xbf16>
    %c0_7 = arith.constant 0 : index
    %c0_8 = arith.constant 0 : index
    %17 = vector.load %arg5[%c0_7, %c0_8] : memref<32x32xbf16, #tpu.memory_space<vmem>>, vector<32x32xbf16>
    %cst_9 = arith.constant dense<0.000000e+00> : vector<8x32xf32>
    %18 = tpu.matmul %16, %17, %cst_9 {dimension_numbers = #tpu.dot_dimension_numbers<[1], [0], [0], [1], [0, 0, 1, 1], [], []>} : vector<8x32xbf16>, vector<32x32xbf16>, vector<8x32xf32> -> vector<8x32xf32>
    %19 = arith.addf %3, %18 : vector<8x32xf32>
    %c0_10 = arith.constant 0 : index
    %c0_11 = arith.constant 0 : index
    %20 = vector.load %arg6[%c0_10, %c0_11] : memref<1x32xf32, #tpu.memory_space<vmem>>, vector<1x32xf32>
    %21 = vector.broadcast %20 : vector<1x32xf32> to vector<8x32xf32>
    %22 = arith.addf %19, %21 : vector<8x32xf32>
    %cst_12 = arith.constant dense<0.000000e+00> : vector<8xf32>
    %23 = vector.multi_reduction <add>, %22, %cst_12 [1] : vector<8x32xf32> to vector<8xf32>
    %24 = vector.shape_cast %23 : vector<8xf32> to vector<8x1xf32>
    %cst_13 = arith.constant 3.200000e+01 : f32
    %25 = vector.broadcast %cst_13 : f32 to vector<8x1xf32>
    %26 = arith.divf %24, %25 : vector<8x1xf32>
    %27 = vector.broadcast %26 : vector<8x1xf32> to vector<8x32xf32>
    %28 = arith.subf %22, %27 : vector<8x32xf32>
    %29 = arith.mulf %28, %28 : vector<8x32xf32>
    %cst_14 = arith.constant dense<0.000000e+00> : vector<8xf32>
    %30 = vector.multi_reduction <add>, %29, %cst_14 [1] : vector<8x32xf32> to vector<8xf32>
    %31 = vector.shape_cast %30 : vector<8xf32> to vector<8x1xf32>
    %cst_15 = arith.constant 3.200000e+01 : f32
    %32 = vector.broadcast %cst_15 : f32 to vector<8x1xf32>
    %33 = arith.divf %31, %32 : vector<8x1xf32>
    %cst_16 = arith.constant 9.99999996E-13 : f32
    %34 = vector.broadcast %cst_16 : f32 to vector<8x1xf32>
    %35 = arith.addf %33, %34 : vector<8x1xf32>
    %36 = math.rsqrt %35 : vector<8x1xf32>
    %37 = vector.broadcast %36 : vector<8x1xf32> to vector<8x32xf32>
    %38 = arith.mulf %28, %37 : vector<8x32xf32>
    %c0_17 = arith.constant 0 : index
    %c0_18 = arith.constant 0 : index
    %39 = vector.load %arg7[%c0_17, %c0_18] : memref<1x32xf32, #tpu.memory_space<vmem>>, vector<1x32xf32>
    %40 = vector.broadcast %39 : vector<1x32xf32> to vector<8x32xf32>
    %41 = arith.mulf %38, %40 : vector<8x32xf32>
    %c0_19 = arith.constant 0 : index
    %c0_20 = arith.constant 0 : index
    %42 = vector.load %arg8[%c0_19, %c0_20] : memref<1x32xf32, #tpu.memory_space<vmem>>, vector<1x32xf32>
    %43 = vector.broadcast %42 : vector<1x32xf32> to vector<8x32xf32>
    %44 = arith.addf %41, %43 : vector<8x32xf32>
    %c0_21 = arith.constant 0 : index
    %c0_22 = arith.constant 0 : index
    %45 = vector.load %arg9[%c0_21, %c0_22] : memref<8x32xf32, #tpu.memory_space<vmem>>, vector<8x32xf32>
    tpu.vector_store %arg9[%c0_21, %c0_22], %44 {strides = array<i32>} : memref<8x32xf32, #tpu.memory_space<vmem>>, vector<8x32xf32>,
    return
  }
  func.func @transform_0(%arg0: i32) -> (i32, i32) {
    %c0_i32 = arith.constant 0 : i32
    %c0_i32_0 = arith.constant 0 : i32
    return %arg0, %c0_i32 : i32, i32
  }
  func.func @transform_1(%arg0: i32) -> (i32, i32) {
    %c0_i32 = arith.constant 0 : i32
    %c0_i32_0 = arith.constant 0 : i32
    return %arg0, %c0_i32 : i32, i32
  }
  func.func @transform_2(%arg0: i32) -> (i32, i32) {
    %c0_i32 = arith.constant 0 : i32
    %c0_i32_0 = arith.constant 0 : i32
    return %arg0, %c0_i32 : i32, i32
  }
  func.func @transform_3(%arg0: i32) -> (i32, i32) {
    %c0_i32 = arith.constant 0 : i32
    %c0_i32_0 = arith.constant 0 : i32
    %c0_i32_1 = arith.constant 0 : i32
    return %c0_i32, %c0_i32_0 : i32, i32
  }
  func.func @transform_4(%arg0: i32) -> (i32, i32) {
    %c0_i32 = arith.constant 0 : i32
    %c0_i32_0 = arith.constant 0 : i32
    %c0_i32_1 = arith.constant 0 : i32
    return %c0_i32, %c0_i32_0 : i32, i32
  }
  func.func @transform_5(%arg0: i32) -> (i32, i32) {
    %c0_i32 = arith.constant 0 : i32
    %c0_i32_0 = arith.constant 0 : i32
    %c0_i32_1 = arith.constant 0 : i32
    return %c0_i32, %c0_i32_0 : i32, i32
  }
  func.func @transform_6(%arg0: i32) -> (i32, i32) {
    %c0_i32 = arith.constant 0 : i32
    %c0_i32_0 = arith.constant 0 : i32
    %c0_i32_1 = arith.constant 0 : i32
    return %c0_i32, %c0_i32_0 : i32, i32
  }
  func.func @transform_7(%arg0: i32) -> (i32, i32) {
    %c0_i32 = arith.constant 0 : i32
    %c0_i32_0 = arith.constant 0 : i32
    %c0_i32_1 = arith.constant 0 : i32
    return %c0_i32, %c0_i32_0 : i32, i32
  }
  func.func @transform_8(%arg0: i32) -> (i32, i32) {
    %c0_i32 = arith.constant 0 : i32
    %c0_i32_0 = arith.constant 0 : i32
    return %arg0, %c0_i32 : i32, i32
  }
}

</mosaic_0001>

<bundles_post_ra>
// kernel: tpu_custom_call.1
= control target key start
LH: loop header
LB: loop body
LE: loop exit
PB: predicated region body
PF: predicated region fallthrough
CT: control target
= control target key end

     0   :  { %13 = vsyncpa [#allocation3], 0  ;;  %s948_s0 = inlined_call_operand.vmem [shape: f32[16,32], index: 0, kind: input, shape index: {}]   ;;  %s949_s1 = inlined_call_operand.vmem [shape: s32[16,1], index: 1, kind: input, shape index: {}]   ;;  %s950_s2 = inlined_call_operand.vmem [shape: s32[16,1], index: 2, kind: input, shape index: {}]   ;;  %s951_s3 = inlined_call_operand.vmem [shape: bf16[32,32], index: 3, kind: input, shape index: {}]   ;;  %s952_s4 = inlined_call_operand.vmem [shape: bf16[32,32], index: 4, kind: input, shape index: {}]   ;;  %s953_s5 = inlined_call_operand.vmem [shape: f32[1,32], index: 5, kind: input, shape index: {}]   ;;  %s954_s6 = inlined_call_operand.vmem [shape: f32[1,32], index: 6, kind: input, shape index: {}]   ;;  %s955_s7 = inlined_call_operand.vmem [shape: f32[1,32], index: 7, kind: input, shape index: {}]   ;;  %s956_s8 = inlined_call_operand.hbm [shape: f32[16,32], index: 8, kind: output, shape index: {}]  }
   0x1   :  { %15 = vsyncpa [#allocation3 + $0x1], 0  ;;  %s816_s27 = smov 0   ;;  %s818_s28 = smov 0  }
   0x2   :  { %s820_s29 = smov 0   ;;  %s822_s30 = smov 0  }
   0x3 LB: > { %s837_s9 = sadd.s32 4294967295, %s765_s30   ;;  %s610_s10 = sadd.s32 4294967294, %s765_s30   ;;  %s765_s30 = sphi %s822_s30, %s964_s30   ;;  %s761_s29 = sphi %s820_s29, %s963_s29   ;;  %s757_s28 = sphi %s818_s28, %s962_s28   ;;  %s753_s27 = sphi %s816_s27, %s961_s27  }
   0x4   : > { %s841_s11 = sadd.s32 1, %s765_s30   ;;  %s211_s12 = sadd.s32 1, %s761_s29 }
   0x5   : > { %s208_s13 = ssub.s32 %s765_s30, %s841_s11  ;;  %p221_p0 = scmp.ne.s32.totalorder %s761_s29, %s757_s28 }
   0x6   : > { %p209_p1 = scmp.eq.s32.totalorder %s208_s13, 0  ;;  %p222_p2 = scmp.eq.s32.totalorder %s837_s9, 1 }
   0x7   : > { %p227_p3 = scmp.ne.s32.totalorder %s757_s28, %s753_s27  ;;  %p228_p4 = scmp.eq.s32.totalorder %s610_s10, 1 }
   0x8   : > { %s852_s14 = scalar_select %p209_p1, %s761_s29, %s211_s12  }
   0x9   : > { %p854_p5 = por %p222_p2, %p221_p0  ;;  %p858_p6 = por %p228_p4, %p227_p3 }
   0xa   : > { %957 = sst [smem:[#allocation5_spill]] %s852_s14  ;;  %p613_p7 = scmp.ge.s32.totalorder %s765_s30, 1 }
   0xb   : > { %p282_p8 = scmp.lt.s32.totalorder %s765_s30, 3 }
   0xd   : > { %p283_p9 = pnand %p613_p7, %p282_p8 }
   0xe   : > { %p323_p10 = scmp.lt.s32.totalorder (!%p283_p9), %s837_s9, 1  ;;  %v697_v0 = vld [vmem:[%s951_s3] sm:$0xff] (!%p283_p9)   ;;  %v767_v1 = vmov (!%p283_p9), 0   ;;  %v768_v2 = vmov (!%p283_p9), 0.0   ;;  %v699_v7 = vld [vmem:[%s951_s3 + $0x8] sm:$0xff] (!%p283_p9)   ;;  %vm769_vm0 = vmmov (!%p283_p9), 0   ;;  %v342_v11 = vlaneseq (!%p283_p9) }
   0xf   : > { %286 = sbr.rel (%p283_p9) target bundleno = 707 (0x2c3), region = 52  ;;  %696 = vset.pattern.permute.xlu0 (!%p283_p9), %v767_v1  ;;  %646 = vmatprep.subr.bf16.mxu1 (!%p283_p9), %v768_v2  ;;  %v698_v6 = vld [vmem:[%s952_s4] sm:$0xff] (!%p283_p9)   ;;  %v700_v10 = vld [vmem:[%s952_s4 + $0x8] sm:$0xff] (!%p283_p9)   ;;  %vm375_vm1 = vcmask (!%p283_p9), 261120  }
  0x10   : > { %647 = vmatpush3.bf16.msra.mxu1 (!%p283_p9), %v697_v0  ;;  %638 = vmatprep.subr.bf16.mxu0 (!%p283_p9), %v768_v2  ;;  %v343_v13 = vand.u32 (!%p283_p9), 127, %v342_v11  ;;  %v625_v22 = vld [vmem:[%s953_s5] ss:$0 sm:$0xff] (!%p283_p9) }
  0x11   : > { %648 = vmatprep.subr.bf16.mxu1 (!%p283_p9), %v768_v2  ;;  %639 = vmatpush3.bf16.msra.mxu0 (!%p283_p9), %v698_v6  ;;  %v626_v38 = vld [vmem:[%s954_s6] ss:$0 sm:$0xff] (!%p283_p9) }
  0x12   : > { %640 = vmatprep.subr.bf16.mxu0 (!%p283_p9), %v768_v2  ;;  %650 = vmatprep.mubr.msk.bf16.mxu1 (!%p283_p9), %vm769_vm0, %v768_v2  ;;  %v627_v40 = vld [vmem:[%s955_s7] ss:$0 sm:$0xff] (!%p283_p9) }
  0x13   : > { %642 = vmatprep.mubr.msk.bf16.mxu0 (!%p283_p9), %vm769_vm0, %v768_v2 }
  0x14   : > { %649 = vmatpush3.bf16.msra.mxu1 (!%p283_p9), %v699_v7 }
  0x15   : > { %641 = vmatpush3.bf16.msra.mxu0 (!%p283_p9), %v700_v10 }
  0x16   : > { %s324_s19 = scalar_select %p323_p10, %s837_s9, 1 }
  0x18   : > { %s615_s20 = sshll.u32 %s324_s19, 3 }
  0x19   : > { %s330_s23 = scalar_lea.vmem %s949_s1, %s615_s20  ;;  %s326_s26 = scalar_lea.vmem %s948_s0, %s615_s20 }
  0x1a   : > { %v344_v3 = vld [vmem:[%s330_s23] sm:$0xff]  ;;  %s334_s13 = scalar_lea.vmem %s950_s2, %s615_s20  ;;  %s320_s23 = sand.u32 1, %s757_s28  }
  0x1b   : > { %v336_v4 = vld [vmem:[%s326_s26] sm:$0xff]  ;;  %346 = vperm.xlu0 %696, %v344_v3   ;;  %s614_s24 = sshll.u32 %s320_s23, 3  ;;  %s514_s14 = scalar_lea.sflag [#allocation3], %s320_s23 }
  0x1c   : > { %v349_v5 = vld [vmem:[%s334_s13] sm:$0xff]  ;;  %v337_v9 = vpack.c.bf16 %v336_v4, %v336_v4  ;;  %s629_s13 = sshll.u32 %s837_s9, 7  ;;  %s322_s17 = scalar_lea.vmem [#allocation2], %s614_s24 }
  0x1d   : > { %v350_v8 = vadd.s32 16, %v349_v5  ;;  %s527_s18 = sshll.u32 %s322_s17, 4  ;;  %s905_s22 = scalar_lea.hbm %s956_s8, %s629_s13  ;;  %s907_s18 = int_to_ptr.vmem [resolvable:$true] %s527_s18 }
  0x1e   : > { %651 = vmatmul.mubr.msk.bf16.vlgmr.msra.gmra.mrb[0].mxu1 %vm375_vm1, %v337_v9  ;;  %s703_s20 = scalar_lea.vmem %s907_s18, 128  ;;  %s770_s9 = smov [#allocation2]  }
  0x1f   : > { %352 = vperm.xlu0 %696, %v350_v8   ;;  %p704_p11 = scmp.ne.s32.totalorder %s907_s18, %s703_s20  ;;  %s707_s24 = sshll.u32 %s770_s9, 4  ;;  %s708_s24 = int_to_ptr.vmem [resolvable:$false] %s707_s24 }
  0x20   : > { %s709_s25 = scalar_lea.vmem %s708_s24, 256  ;;  %p710_p0 = scmp.lt.s32.totalorder %s907_s18, %s708_s24 }
  0x21   : > { %p705_p12 = pnand %p704_p11, %p854_p5  ;;  %p711_p1 = scmp.lt.s32.totalorder %s709_s25, %s703_s20 }
  0x23   : > { %p706_p13 = pneg %p705_p12  ;;  %p712_p2 = por %p711_p1, %p710_p0 }
  0x25   : > { %p713_p3 = pnand %p712_p2, %p706_p13 }
  0x9a   : > { %v347_v12 = vpop.permute.xlu0 %346 }
  0x9b   : > { %vm348_vm2 = vcmp.eq.s32.totalorder %v343_v13, %v347_v12 }
  0x9e   : > { %v353_v14 = vpop.permute.xlu0 %352 }
  0x9f   : > { %vm354_vm3 = vcmp.eq.s32.totalorder %v343_v13, %v353_v14 }
  0xa0   : > { %vm355_vm4 = vmor %vm348_vm2, %vm354_vm3 }
  0xa1   : > { %v618_v15 = vsel %vm355_vm4, 1.0, %v768_v2 }
  0xa2   : > { %v358_v16 = vpack.c.bf16 %v618_v15, %v618_v15 }
  0xa4   : > { %643 = vmatmul.mubr.msk.bf16.vlgmr.msra.gmra.mrb[0].mxu0 %vm375_vm1, %v358_v16 }
  0xf1   : > { %v468_v17 = vpop.f32.mrb[0].mxu1 }
  0xf2   : > { %v652_v18 = vpop.f32.mrb[1].mxu1 }
  0xf3   : > { %v471_v19 = vpop.f32.mrb[2].mxu1 }
  0xf4   : > { %v653_v20 = vpop.f32.mrb[3].mxu1 }
 0x177   : > { %v413_v21 = vpop.f32.mrb[0].mxu0 }
 0x178   : > { %v469_v23 = vadd.f32 %v468_v17, %v413_v21  ;;  %v644_v24 = vpop.f32.mrb[1].mxu0 }
 0x179   : > { %v416_v25 = vpop.f32.mrb[2].mxu0 }
 0x17a   : > { %v645_v26 = vpop.f32.mrb[3].mxu0  ;;  %v481_v27 = vadd.f32 %v625_v22, %v469_v23 }
 0x17c   : > { %v482_v28 = vsel %vm375_vm1, %v481_v27, 0.0 }
 0x17d   : > { %483 = vadd.xlane.f32.xlu1 %v482_v28 }
 0x20a   : > { %v484_v29 = vpop.xlane.xlu1 %483 }
 0x20b   : > { %v486_v30 = vmul.f32 0.03125, %v484_v29 }
 0x20d   : > { %v487_v31 = vsub.f32 %v481_v27, %v486_v30 }
 0x20f   : > { %v488_v32 = vmul.f32 %v487_v31, %v487_v31 }
 0x211   : > { %v489_v33 = vsel %vm375_vm1, %v488_v32, 0.0 }
 0x212   : > { %490 = vadd.xlane.f32.xlu1 %v489_v33 }
 0x29f   : > { %v491_v34 = vpop.xlane.xlu1 %490 }
 0x2a0   : > { %v492_v35 = vmul.f32 0.03125, %v491_v34 }
 0x2a2   : > { %v493_v36 = vadd.f32 1e-12, %v492_v35 }
 0x2a4   : > { %701 = vrsqrt.f32 %v493_v36 }
 0x2ae   : > { %v702_v37 = vpop.eup %701 }
 0x2af   : > { %v495_v39 = vmul.f32 %v702_v37, %v487_v31 }
 0x2b1   : > { %v503_v41 = vmul.f32 %v626_v38, %v495_v39 }
 0x2b3   : > { %v511_v42 = vadd.f32 %v627_v40, %v503_v41 }
 0x2b5   : > { %512 = vst.msk [vmem:[%s322_s17] sm:$0xff] %vm375_vm1, %v511_v42 }
 0x2b6   : > { %716 = shalt.err (!%p713_p3)
}
 0x2b7   : > { %s717_s23 = scalar_lea.hbm %s905_s22, 128  ;;  %s721_s12 = scalar_lea.hbm %s956_s8, 256 }
 0x2b8   : > { %p718_p4 = scmp.ne.s32.totalorder %s905_s22, %s717_s23  ;;  %p722_p9 = scmp.lt.u32.totalorder %s905_s22, %s956_s8 }
 0x2b9   : > { %p723_p10 = scmp.lt.u32.totalorder %s721_s12, %s717_s23  ;;  %p725_p12 = scmp.lt.u32.totalorder %s717_s23, %s905_s22 }
 0x2ba   : > { %p719_p7 = pnand %p718_p4, %p854_p5 }
 0x2bb   : > { %p724_p11 = por %p723_p10, %p722_p9 }
 0x2bc   : > { %p720_p8 = pneg %p719_p7 }
 0x2bd   : > { %p726_p13 = por %p725_p12, %p724_p11 }
 0x2bf   : > { %p727_p0 = pnand %p726_p13, %p720_p8 }
 0x2c1   : > { %730 = shalt.err (!%p727_p0)
}
 0x2c2   : > { %654 = dma.vmem_to_hbm [thread:$0]  (%p854_p5), %s907_s18, 128, %s905_s22, %s514_s14  }
 0x2c3 PF: > { %p660_p1 = scmp.ge.s32.totalorder %s765_s30, 2  ;;  %s539_s19 = sand.u32 1, %s753_s27  }
 0x2c4   : > { %s540_s21 = scalar_lea.sflag [#allocation3], %s539_s19 }
 0x2c5   : > { %p657_p2 = pnand %p660_p1, %p858_p6 }
 0x2c7   : > { %748 = dma.done.wait (!%p657_p2), %s540_s21, 128  }
 0x2c8   : > { %750 = vsyncadd (!%p657_p2), %s540_s21, 4294967168  ;;  %s960_s20 = sld [smem:[#allocation5_spill]]  ;;  %p18_p3 = scmp.ge.s32.totalorder %s841_s11, 4  }
 0x2c9   : > { %s961_s27 = smov %s757_s28  ;;  %s962_s28 = smov %s761_s29 }
 0x2ca   : > { %s964_s30 = smov %s841_s11  ;;  %20 = sbr.rel (!%p18_p3) target bundleno = 3 (0x3), region = 93 }
 0x2ce   : > { %s963_s29 = smov %s960_s20 }
 0x2d1   :  { %545 = vsyncpa [#allocation3], 1 }
 0x2d2   :  { %547 = vsyncpa [#allocation3 + $0x1], 1 }

// kernel: tpu_custom_call.1
= control target key start
LH: loop header
LB: loop body
LE: loop exit
PB: predicated region body
PF: predicated region fallthrough
CT: control target
= control target key end

     0   :  { %13 = vsyncpa [#allocation3], 0  ;;  %s948_s0 = inlined_call_operand.vmem [shape: f32[16,32], index: 0, kind: input, shape index: {}]   ;;  %s949_s1 = inlined_call_operand.vmem [shape: s32[16,1], index: 1, kind: input, shape index: {}]   ;;  %s950_s2 = inlined_call_operand.vmem [shape: s32[16,1], index: 2, kind: input, shape index: {}]   ;;  %s951_s3 = inlined_call_operand.vmem [shape: bf16[32,32], index: 3, kind: input, shape index: {}]   ;;  %s952_s4 = inlined_call_operand.vmem [shape: bf16[32,32], index: 4, kind: input, shape index: {}]   ;;  %s953_s5 = inlined_call_operand.vmem [shape: f32[1,32], index: 5, kind: input, shape index: {}]   ;;  %s954_s6 = inlined_call_operand.vmem [shape: f32[1,32], index: 6, kind: input, shape index: {}]   ;;  %s955_s7 = inlined_call_operand.vmem [shape: f32[1,32], index: 7, kind: input, shape index: {}]   ;;  %s956_s8 = inlined_call_operand.hbm [shape: f32[16,32], index: 8, kind: output, shape index: {}]  }
   0x1   :  { %15 = vsyncpa [#allocation3 + $0x1], 0  ;;  %s816_s27 = smov 0   ;;  %s818_s28 = smov 0  }
   0x2   :  { %s820_s29 = smov 0   ;;  %s822_s30 = smov 0  }
   0x3 LB: > { %s837_s9 = sadd.s32 4294967295, %s765_s30   ;;  %s610_s10 = sadd.s32 4294967294, %s765_s30   ;;  %s765_s30 = sphi %s822_s30, %s964_s30   ;;  %s761_s29 = sphi %s820_s29, %s963_s29   ;;  %s757_s28 = sphi %s818_s28, %s962_s28   ;;  %s753_s27 = sphi %s816_s27, %s961_s27  }
   0x4   : > { %s841_s11 = sadd.s32 1, %s765_s30   ;;  %s211_s12 = sadd.s32 1, %s761_s29 }
   0x5   : > { %s208_s13 = ssub.s32 %s765_s30, %s841_s11  ;;  %p221_p0 = scmp.ne.s32.totalorder %s761_s29, %s757_s28 }
   0x6   : > { %p209_p1 = scmp.eq.s32.totalorder %s208_s13, 0  ;;  %p222_p2 = scmp.eq.s32.totalorder %s837_s9, 1 }
   0x7   : > { %p227_p3 = scmp.ne.s32.totalorder %s757_s28, %s753_s27  ;;  %p228_p4 = scmp.eq.s32.totalorder %s610_s10, 1 }
   0x8   : > { %s852_s14 = scalar_select %p209_p1, %s761_s29, %s211_s12  }
   0x9   : > { %p854_p5 = por %p222_p2, %p221_p0  ;;  %p858_p6 = por %p228_p4, %p227_p3 }
   0xa   : > { %957 = sst [smem:[#allocation5_spill]] %s852_s14  ;;  %p613_p7 = scmp.ge.s32.totalorder %s765_s30, 1 }
   0xb   : > { %p282_p8 = scmp.lt.s32.totalorder %s765_s30, 3 }
   0xd   : > { %p283_p9 = pnand %p613_p7, %p282_p8 }
   0xe   : > { %p323_p10 = scmp.lt.s32.totalorder (!%p283_p9), %s837_s9, 1  ;;  %v697_v0 = vld [vmem:[%s951_s3] sm:$0xff] (!%p283_p9)   ;;  %v767_v1 = vmov (!%p283_p9), 0   ;;  %v768_v2 = vmov (!%p283_p9), 0.0   ;;  %v699_v7 = vld [vmem:[%s951_s3 + $0x8] sm:$0xff] (!%p283_p9)   ;;  %vm769_vm0 = vmmov (!%p283_p9), 0   ;;  %v342_v11 = vlaneseq (!%p283_p9) }
   0xf   : > { %286 = sbr.rel (%p283_p9) target bundleno = 707 (0x2c3), region = 52  ;;  %696 = vset.pattern.permute.xlu0 (!%p283_p9), %v767_v1  ;;  %646 = vmatprep.subr.bf16.mxu1 (!%p283_p9), %v768_v2  ;;  %v698_v6 = vld [vmem:[%s952_s4] sm:$0xff] (!%p283_p9)   ;;  %v700_v10 = vld [vmem:[%s952_s4 + $0x8] sm:$0xff] (!%p283_p9)   ;;  %vm375_vm1 = vcmask (!%p283_p9), 261120  }
  0x10   : > { %647 = vmatpush3.bf16.msra.mxu1 (!%p283_p9), %v697_v0  ;;  %638 = vmatprep.subr.bf16.mxu0 (!%p283_p9), %v768_v2  ;;  %v343_v13 = vand.u32 (!%p283_p9), 127, %v342_v11  ;;  %v625_v22 = vld [vmem:[%s953_s5] ss:$0 sm:$0xff] (!%p283_p9) }
  0x11   : > { %648 = vmatprep.subr.bf16.mxu1 (!%p283_p9), %v768_v2  ;;  %639 = vmatpush3.bf16.msra.mxu0 (!%p283_p9), %v698_v6  ;;  %v626_v38 = vld [vmem:[%s954_s6] ss:$0 sm:$0xff] (!%p283_p9) }
  0x12   : > { %640 = vmatprep.subr.bf16.mxu0 (!%p283_p9), %v768_v2  ;;  %650 = vmatprep.mubr.msk.bf16.mxu1 (!%p283_p9), %vm769_vm0, %v768_v2  ;;  %v627_v40 = vld [vmem:[%s955_s7] ss:$0 sm:$0xff] (!%p283_p9) }
  0x13   : > { %642 = vmatprep.mubr.msk.bf16.mxu0 (!%p283_p9), %vm769_vm0, %v768_v2 }
  0x14   : > { %649 = vmatpush3.bf16.msra.mxu1 (!%p283_p9), %v699_v7 }
  0x15   : > { %641 = vmatpush3.bf16.msra.mxu0 (!%p283_p9), %v700_v10 }
  0x16   : > { %s324_s19 = scalar_select %p323_p10, %s837_s9, 1 }
  0x18   : > { %s615_s20 = sshll.u32 %s324_s19, 3 }
  0x19   : > { %s330_s23 = scalar_lea.vmem %s949_s1, %s615_s20  ;;  %s326_s26 = scalar_lea.vmem %s948_s0, %s615_s20 }
  0x1a   : > { %v344_v3 = vld [vmem:[%s330_s23] sm:$0xff]  ;;  %s334_s13 = scalar_lea.vmem %s950_s2, %s615_s20  ;;  %s320_s23 = sand.u32 1, %s757_s28  }
  0x1b   : > { %v336_v4 = vld [vmem:[%s326_s26] sm:$0xff]  ;;  %346 = vperm.xlu0 %696, %v344_v3   ;;  %s614_s24 = sshll.u32 %s320_s23, 3  ;;  %s514_s14 = scalar_lea.sflag [#allocation3], %s320_s23 }
  0x1c   : > { %v349_v5 = vld [vmem:[%s334_s13] sm:$0xff]  ;;  %v337_v9 = vpack.c.bf16 %v336_v4, %v336_v4  ;;  %s629_s13 = sshll.u32 %s837_s9, 7  ;;  %s322_s17 = scalar_lea.vmem [#allocation2], %s614_s24 }
  0x1d   : > { %v350_v8 = vadd.s32 16, %v349_v5  ;;  %s527_s18 = sshll.u32 %s322_s17, 4  ;;  %s905_s22 = scalar_lea.hbm %s956_s8, %s629_s13  ;;  %s907_s18 = int_to_ptr.vmem [resolvable:$true] %s527_s18 }
  0x1e   : > { %651 = vmatmul.mubr.msk.bf16.vlgmr.msra.gmra.mrb[0].mxu1 %vm375_vm1, %v337_v9  ;;  %s703_s20 = scalar_lea.vmem %s907_s18, 128  ;;  %s770_s9 = smov [#allocation2]  }
  0x1f   : > { %352 = vperm.xlu0 %696, %v350_v8   ;;  %p704_p11 = scmp.ne.s32.totalorder %s907_s18, %s703_s20  ;;  %s707_s24 = sshll.u32 %s770_s9, 4  ;;  %s708_s24 = int_to_ptr.vmem [resolvable:$false] %s707_s24 }
  0x20   : > { %s709_s25 = scalar_lea.vmem %s708_s24, 256  ;;  %p710_p0 = scmp.lt.s32.totalorder %s907_s18, %s708_s24 }
  0x21   : > { %p705_p12 = pnand %p704_p11, %p854_p5  ;;  %p711_p1 = scmp.lt.s32.totalorder %s709_s25, %s703_s20 }
  0x23   : > { %p706_p13 = pneg %p705_p12  ;;  %p712_p2 = por %p711_p1, %p710_p0 }
  0x25   : > { %p713_p3 = pnand %p712_p2, %p706_p13 }
  0x9a   : > { %v347_v12 = vpop.permute.xlu0 %346 }
  0x9b   : > { %vm348_vm2 = vcmp.eq.s32.totalorder %v343_v13, %v347_v12 }
  0x9e   : > { %v353_v14 = vpop.permute.xlu0 %352 }
  0x9f   : > { %vm354_vm3 = vcmp.eq.s32.totalorder %v343_v13, %v353_v14 }
  0xa0   : > { %vm355_vm4 = vmor %vm348_vm2, %vm354_vm3 }
  0xa1   : > { %v618_v15 = vsel %vm355_vm4, 1.0, %v768_v2 }
  0xa2   : > { %v358_v16 = vpack.c.bf16 %v618_v15, %v618_v15 }
  0xa4   : > { %643 = vmatmul.mubr.msk.bf16.vlgmr.msra.gmra.mrb[0].mxu0 %vm375_vm1, %v358_v16 }
  0xf1   : > { %v468_v17 = vpop.f32.mrb[0].mxu1 }
  0xf2   : > { %v652_v18 = vpop.f32.mrb[1].mxu1 }
  0xf3   : > { %v471_v19 = vpop.f32.mrb[2].mxu1 }
  0xf4   : > { %v653_v20 = vpop.f32.mrb[3].mxu1 }
 0x177   : > { %v413_v21 = vpop.f32.mrb[0].mxu0 }
 0x178   : > { %v469_v23 = vadd.f32 %v468_v17, %v413_v21  ;;  %v644_v24 = vpop.f32.mrb[1].mxu0 }
 0x179   : > { %v416_v25 = vpop.f32.mrb[2].mxu0 }
 0x17a   : > { %v645_v26 = vpop.f32.mrb[3].mxu0  ;;  %v481_v27 = vadd.f32 %v625_v22, %v469_v23 }
 0x17c   : > { %v482_v28 = vsel %vm375_vm1, %v481_v27, 0.0 }
 0x17d   : > { %483 = vadd.xlane.f32.xlu1 %v482_v28 }
 0x20a   : > { %v484_v29 = vpop.xlane.xlu1 %483 }
 0x20b   : > { %v486_v30 = vmul.f32 0.03125, %v484_v29 }
 0x20d   : > { %v487_v31 = vsub.f32 %v481_v27, %v486_v30 }
 0x20f   : > { %v488_v32 = vmul.f32 %v487_v31, %v487_v31 }
 0x211   : > { %v489_v33 = vsel %vm375_vm1, %v488_v32, 0.0 }
 0x212   : > { %490 = vadd.xlane.f32.xlu1 %v489_v33 }
 0x29f   : > { %v491_v34 = vpop.xlane.xlu1 %490 }
 0x2a0   : > { %v492_v35 = vmul.f32 0.03125, %v491_v34 }
 0x2a2   : > { %v493_v36 = vadd.f32 1e-12, %v492_v35 }
 0x2a4   : > { %701 = vrsqrt.f32 %v493_v36 }
 0x2ae   : > { %v702_v37 = vpop.eup %701 }
 0x2af   : > { %v495_v39 = vmul.f32 %v702_v37, %v487_v31 }
 0x2b1   : > { %v503_v41 = vmul.f32 %v626_v38, %v495_v39 }
 0x2b3   : > { %v511_v42 = vadd.f32 %v627_v40, %v503_v41 }
 0x2b5   : > { %512 = vst.msk [vmem:[%s322_s17] sm:$0xff] %vm375_vm1, %v511_v42 }
 0x2b6   : > { %716 = shalt.err (!%p713_p3)
}
 0x2b7   : > { %s717_s23 = scalar_lea.hbm %s905_s22, 128  ;;  %s721_s12 = scalar_lea.hbm %s956_s8, 256 }
 0x2b8   : > { %p718_p4 = scmp.ne.s32.totalorder %s905_s22, %s717_s23  ;;  %p722_p9 = scmp.lt.u32.totalorder %s905_s22, %s956_s8 }
 0x2b9   : > { %p723_p10 = scmp.lt.u32.totalorder %s721_s12, %s717_s23  ;;  %p725_p12 = scmp.lt.u32.totalorder %s717_s23, %s905_s22 }
 0x2ba   : > { %p719_p7 = pnand %p718_p4, %p854_p5 }
 0x2bb   : > { %p724_p11 = por %p723_p10, %p722_p9 }
 0x2bc   : > { %p720_p8 = pneg %p719_p7 }
 0x2bd   : > { %p726_p13 = por %p725_p12, %p724_p11 }
 0x2bf   : > { %p727_p0 = pnand %p726_p13, %p720_p8 }
 0x2c1   : > { %730 = shalt.err (!%p727_p0)
}
 0x2c2   : > { %654 = dma.vmem_to_hbm [thread:$0]  (%p854_p5), %s907_s18, 128, %s905_s22, %s514_s14  }
 0x2c3 PF: > { %p660_p1 = scmp.ge.s32.totalorder %s765_s30, 2  ;;  %s539_s19 = sand.u32 1, %s753_s27  }
 0x2c4   : > { %s540_s21 = scalar_lea.sflag [#allocation3], %s539_s19 }
 0x2c5   : > { %p657_p2 = pnand %p660_p1, %p858_p6 }
 0x2c7   : > { %748 = dma.done.wait (!%p657_p2), %s540_s21, 128  }
 0x2c8   : > { %750 = vsyncadd (!%p657_p2), %s540_s21, 4294967168  ;;  %s960_s20 = sld [smem:[#allocation5_spill]]  ;;  %p18_p3 = scmp.ge.s32.totalorder %s841_s11, 4  }
 0x2c9   : > { %s961_s27 = smov %s757_s28  ;;  %s962_s28 = smov %s761_s29 }
 0x2ca   : > { %s964_s30 = smov %s841_s11  ;;  %20 = sbr.rel (!%p18_p3) target bundleno = 3 (0x3), region = 93 }
 0x2ce   : > { %s963_s29 = smov %s960_s20 }
 0x2d1   :  { %545 = vsyncpa [#allocation3], 1 }
 0x2d2   :  { %547 = vsyncpa [#allocation3 + $0x1], 1 }

</bundles_post_ra>
